<compile_context>
chip_gen: v7x
topology: tpu7x:2x2x1
jax: 0.10.0
libtpu: 0.0.40
codegen_flags: <defaults>
</compile_context>

<pallas_src>
import functools
import math

import jax
import jax.numpy as jnp
from jax.experimental import pallas as pl
from jax.experimental.pallas import tpu as pltpu

D_MODEL = 32
D_HIDDEN = 2048          # hard-coded in the PyTorch module
TILE_M_DEFAULT = 2048    # fits all generations with d_hidden chunking
CHUNK_H_DEFAULT = 512    # hidden-dim chunk inside the kernel


def _round_up(x, m):
    return (x + m - 1) // m * m


def _vmem_limit_bytes():
    """VMEM limit with headroom, clamped to per-TensorCore physical (v7x = 64 MiB)."""
    try:
        cap = int(pltpu.get_tpu_info().vmem_capacity_bytes)
    except Exception:
        cap = 64 << 20
    cap = min(cap, 64 << 20)   # info query may report chip-level (2 TCs on v7x)
    return cap * 3 // 4


def _bf16_gelu_ok():
    """bf16 VPU/EUP exists on v6e and later; keep f32 elementwise math on <= v5."""
    try:
        kind = jax.devices()[0].device_kind.lower()
    except Exception:
        return False
    return not any(t in kind for t in ("v2", "v3", "v4", "v5"))


def _ffn_kernel(x_ref, w1_ref, b1_ref, w2_ref, b2_ref, o_ref, *,
                n_chunks, chunk_h, gelu_bf16):
    # x_ref : (tile_m, d_model) f32      w1_ref: (d_model, d_hidden) bf16
    # b1_ref: (1, d_hidden)     f32      w2_ref: (d_hidden, d_model) bf16
    # b2_ref: (1, d_model)      f32      o_ref : (tile_m, d_model)   f32
    x = x_ref[...].astype(jnp.bfloat16)            # hoisted: one cast per tile
    acc = jnp.zeros(o_ref.shape, jnp.float32)      # (tile_m, d_model) accumulator

    gelu_dtype = jnp.bfloat16 if gelu_bf16 else jnp.float32
    c0 = jnp.asarray(math.sqrt(2.0 / math.pi), gelu_dtype)
    c1 = jnp.asarray(0.044715, gelu_dtype)
    half = jnp.asarray(0.5, gelu_dtype)
    one = jnp.asarray(1.0, gelu_dtype)

    # Chunk the hidden dimension: h (tile_m, chunk_h) never exists as a full
    # (tile_m, 2048) temporary.  Static slice offsets -> guaranteed lowering,
    # MXU work of chunk c+1 overlaps GELU of chunk c in the LLO schedule.
    for c in range(n_chunks):
        lo = c * chunk_h
        h = jnp.dot(x, w1_ref[:, lo:lo + chunk_h],
                    preferred_element_type=jnp.float32)
        h = h + b1_ref[:, lo:lo + chunk_h]          # bias add in f32
        h = h.astype(gelu_dtype)                    # single downcast (no-op on v5e)
        # tanh-approximate GELU, factored polynomial (one fewer multiply).
        h = half * h * (one + jnp.tanh(c0 * h * (one + c1 * (h * h))))
        # Dropout: identity (eval mode).
        acc = acc + jnp.dot(h.astype(jnp.bfloat16),
                            w2_ref[lo:lo + chunk_h, :],
                            preferred_element_type=jnp.float32)

    o_ref[...] = (acc + b2_ref[...]).astype(o_ref.dtype)


def feed_forward(x, w1, b1, w2, b2, *, tile_m=TILE_M_DEFAULT,
                 chunk_h=CHUNK_H_DEFAULT):
    """x: (batch, seq, d_model) float32. Returns same shape."""
    batch, seq, d_model = x.shape
    d_hidden = w1.shape[1]
    m = batch * seq
    x2d = x.reshape(m, d_model)

    # Hidden-dim chunking (must divide d_hidden evenly).
    chunk_h = min(chunk_h, d_hidden)
    if d_hidden % chunk_h != 0:
        chunk_h = d_hidden
    n_chunks = d_hidden // chunk_h

    # M tiling: sublane aligned, capped by the (padded) row count.
    tile_m = max(8, min(tile_m, _round_up(m, 8)))
    # Guarantee >= 2 grid steps so both TensorCores get work on dual-core chips.
    if m > 8 and _round_up(m, tile_m) // tile_m < 2:
        tile_m = _round_up(pl.cdiv(m, 2), 8)
    m_pad = _round_up(m, tile_m)
    if m_pad != m:
        x2d = jnp.pad(x2d, ((0, m_pad - m), (0, 0)))

    w1_bf = w1.astype(jnp.bfloat16)
    w2_bf = w2.astype(jnp.bfloat16)
    b1_2d = b1.reshape(1, d_hidden).astype(jnp.float32)
    b2_2d = b2.reshape(1, d_model).astype(jnp.float32)

    kernel = functools.partial(_ffn_kernel, n_chunks=n_chunks,
                               chunk_h=chunk_h, gelu_bf16=_bf16_gelu_ok())

    grid = (m_pad // tile_m,)

    cost = pl.CostEstimate(
        flops=4 * m_pad * d_model * d_hidden,            # two matmuls
        transcendentals=m_pad * d_hidden,                # one tanh per hidden elem
        bytes_accessed=(m_pad * d_model * 4              # x
                        + d_model * d_hidden * 2         # W1 (bf16)
                        + d_hidden * d_model * 2         # W2 (bf16)
                        + (d_hidden + d_model) * 4       # biases
                        + m_pad * d_model * 4),          # out
    )

    out2d = pl.pallas_call(
        kernel,
        out_shape=jax.ShapeDtypeStruct((m_pad, d_model), x.dtype),
        grid=grid,
        in_specs=[
            pl.BlockSpec((tile_m, d_model), lambda i: (i, 0)),    # x tile (pipelined)
            pl.BlockSpec((d_model, d_hidden), lambda i: (0, 0)),  # W1 (resident)
            pl.BlockSpec((1, d_hidden), lambda i: (0, 0)),        # b1 (resident)
            pl.BlockSpec((d_hidden, d_model), lambda i: (0, 0)),  # W2 (resident)
            pl.BlockSpec((1, d_model), lambda i: (0, 0)),         # b2 (resident)
        ],
        out_specs=pl.BlockSpec((tile_m, d_model), lambda i: (i, 0)),
        compiler_params=pltpu.CompilerParams(
            dimension_semantics=("parallel",),
            vmem_limit_bytes=_vmem_limit_bytes(),
        ),
        cost_estimate=cost,
    )(x2d, w1_bf, b1_2d, w2_bf, b2_2d)

    return out2d[:m].reshape(batch, seq, d_model)


def init_params(key, d_model=D_MODEL, d_hidden=D_HIDDEN):
    """Deterministic init mimicking nn.Linear default (uniform +/- 1/sqrt(fan_in))."""
    k1, k2, k3, k4 = jax.random.split(key, 4)
    bound1 = 1.0 / math.sqrt(d_model)
    bound2 = 1.0 / math.sqrt(d_hidden)
    # Stored already transposed for x @ W form: (in, out).
    w1 = jax.random.uniform(k1, (d_model, d_hidden), jnp.float32, -bound1, bound1)
    b1 = jax.random.uniform(k2, (d_hidden,), jnp.float32, -bound1, bound1)
    w2 = jax.random.uniform(k3, (d_hidden, d_model), jnp.float32, -bound2, bound2)
    b2 = jax.random.uniform(k4, (d_model,), jnp.float32, -bound2, bound2)
    return w1, b1, w2, b2


def _reference_exact_f32(x, w1, b1, w2, b2):
    # PyTorch module semantics: f32 matmuls, exact-erf GELU, dropout = identity.
    h = jax.nn.gelu(x @ w1 + b1, approximate=False)
    return h @ w2 + b2


def _reference_matched(x, w1, b1, w2, b2, *, gelu_bf16):
    # Same numerics as the kernel: bf16 MXU operands, f32 accumulation,
    # tanh GELU in the same dtype the kernel uses.
    h = jnp.dot(x.astype(jnp.bfloat16), w1.astype(jnp.bfloat16),
                preferred_element_type=jnp.float32) + b1
    if gelu_bf16:
        h = h.astype(jnp.bfloat16)
    h = jax.nn.gelu(h, approximate=True)
    return jnp.dot(h.astype(jnp.bfloat16), w2.astype(jnp.bfloat16),
                   preferred_element_type=jnp.float32) + b2


if __name__ == "__main__":
    key = jax.random.PRNGKey(0)
    kx, kp, kx2 = jax.random.split(key, 3)

    w1, b1, w2, b2 = init_params(kp)
    gelu_bf16 = _bf16_gelu_ok()

    # Small shape (forced into 2 grid steps for megacore coverage).
    x_small = jax.random.normal(kx, (2, 8, D_MODEL), jnp.float32)
    # Larger shape exercising the M grid split + padding (600 rows -> 2 tiles).
    x_big = jax.random.normal(kx2, (2, 300, D_MODEL), jnp.float32)

    for x in (x_small, x_big):
        out = jax.block_until_ready(feed_forward(x, w1, b1, w2, b2))
        assert out.shape == x.shape

        ref_matched = _reference_matched(x, w1, b1, w2, b2, gelu_bf16=gelu_bf16)
        ref_exact = _reference_exact_f32(x, w1, b1, w2, b2)
        # Check vs a reference with matching numerics (validates plumbing).
        assert jnp.allclose(out, ref_matched, atol=1e-2, rtol=1e-2), \
            float(jnp.max(jnp.abs(out - ref_matched)))
        # Looser check vs exact-erf f32 module semantics (bf16 + tanh GELU).
        assert jnp.allclose(out, ref_exact, atol=5e-2, rtol=5e-2), \
            float(jnp.max(jnp.abs(out - ref_exact)))

    print("KERNEL_OK")
</pallas_src>

<mosaic_0001>
module attributes {stable_mosaic.version = 11 : i64} {
  func.func @_ffn_kernel(%arg0: i32, %arg1: memref<8x32xf32, #tpu.memory_space<vmem>>, %arg2: memref<32x2048xbf16, #tpu.memory_space<vmem>>, %arg3: memref<1x2048xf32, #tpu.memory_space<vmem>>, %arg4: memref<2048x32xbf16, #tpu.memory_space<vmem>>, %arg5: memref<1x32xf32, #tpu.memory_space<vmem>>, %arg6: memref<8x32xf32, #tpu.memory_space<vmem>>) attributes {dimension_semantics = [#tpu.dimension_semantics<parallel>], iteration_bounds = array<i64: 2>, scalar_prefetch = 0 : i64, scratch_operands = 0 : i64, tpu.core_type = #tpu.core_type<tc>, window_params = [{transform_indices = @transform_0, window_bounds = array<i64: 8, 32>}, {pipeline_mode = #tpu.pipeline_mode<synchronous>, transform_indices = @transform_1, window_bounds = array<i64: 32, 2048>}, {pipeline_mode = #tpu.pipeline_mode<synchronous>, transform_indices = @transform_2, window_bounds = array<i64: 1, 2048>}, {pipeline_mode = #tpu.pipeline_mode<synchronous>, transform_indices = @transform_3, window_bounds = array<i64: 2048, 32>}, {pipeline_mode = #tpu.pipeline_mode<synchronous>, transform_indices = @transform_4, window_bounds = array<i64: 1, 32>}, {transform_indices = @transform_5, window_bounds = array<i64: 8, 32>}]} {
    %c0 = arith.constant 0 : index
    %c0_0 = arith.constant 0 : index
    %0 = vector.load %arg1[%c0, %c0_0] : memref<8x32xf32, #tpu.memory_space<vmem>>, vector<8x32xf32>
    %1 = arith.truncf %0 : vector<8x32xf32> to vector<8x32xbf16>
    %cst = arith.constant 0.000000e+00 : f32
    %2 = vector.broadcast %cst : f32 to vector<8x32xf32>
    %c0_1 = arith.constant 0 : index
    %c0_2 = arith.constant 0 : index
    %3 = vector.load %arg2[%c0_1, %c0_2] : memref<32x2048xbf16, #tpu.memory_space<vmem>>, vector<32x512xbf16>
    %cst_3 = arith.constant dense<0.000000e+00> : vector<8x512xf32>
    %4 = tpu.matmul %1, %3, %cst_3 {dimension_numbers = #tpu.dot_dimension_numbers<[1], [0], [0], [1], [0, 0, 1, 1], [], []>} : vector<8x32xbf16>, vector<32x512xbf16>, vector<8x512xf32> -> vector<8x512xf32>
    %c0_4 = arith.constant 0 : index
    %c0_5 = arith.constant 0 : index
    %5 = vector.load %arg3[%c0_4, %c0_5] : memref<1x2048xf32, #tpu.memory_space<vmem>>, vector<1x512xf32>
    %6 = vector.broadcast %5 : vector<1x512xf32> to vector<8x512xf32>
    %7 = arith.addf %4, %6 : vector<8x512xf32>
    %8 = arith.truncf %7 : vector<8x512xf32> to vector<8x512xbf16>
    %cst_6 = arith.constant 5.000000e-01 : bf16
    %9 = vector.broadcast %cst_6 : bf16 to vector<8x512xbf16>
    %10 = arith.mulf %9, %8 : vector<8x512xbf16>
    %cst_7 = arith.constant 7.968750e-01 : bf16
    %11 = vector.broadcast %cst_7 : bf16 to vector<8x512xbf16>
    %12 = arith.mulf %11, %8 : vector<8x512xbf16>
    %13 = arith.mulf %8, %8 : vector<8x512xbf16>
    %cst_8 = arith.constant 4.467770e-02 : bf16
    %14 = vector.broadcast %cst_8 : bf16 to vector<8x512xbf16>
    %15 = arith.mulf %14, %13 : vector<8x512xbf16>
    %cst_9 = arith.constant 1.000000e+00 : bf16
    %16 = vector.broadcast %cst_9 : bf16 to vector<8x512xbf16>
    %17 = arith.addf %16, %15 : vector<8x512xbf16>
    %18 = arith.mulf %12, %17 : vector<8x512xbf16>
    %19 = math.tanh %18 : vector<8x512xbf16>
    %cst_10 = arith.constant 1.000000e+00 : bf16
    %20 = vector.broadcast %cst_10 : bf16 to vector<8x512xbf16>
    %21 = arith.addf %20, %19 : vector<8x512xbf16>
    %22 = arith.mulf %10, %21 : vector<8x512xbf16>
    %c0_11 = arith.constant 0 : index
    %c0_12 = arith.constant 0 : index
    %23 = vector.load %arg4[%c0_11, %c0_12] : memref<2048x32xbf16, #tpu.memory_space<vmem>>, vector<512x32xbf16>
    %cst_13 = arith.constant dense<0.000000e+00> : vector<8x32xf32>
    %24 = tpu.matmul %22, %23, %cst_13 {dimension_numbers = #tpu.dot_dimension_numbers<[1], [0], [0], [1], [0, 0, 1, 1], [], []>} : vector<8x512xbf16>, vector<512x32xbf16>, vector<8x32xf32> -> vector<8x32xf32>
    %25 = arith.addf %2, %24 : vector<8x32xf32>
    %c0_14 = arith.constant 0 : index
    %c512 = arith.constant 512 : index
    %26 = vector.load %arg2[%c0_14, %c512] : memref<32x2048xbf16, #tpu.memory_space<vmem>>, vector<32x512xbf16>
    %cst_15 = arith.constant dense<0.000000e+00> : vector<8x512xf32>
    %27 = tpu.matmul %1, %26, %cst_15 {dimension_numbers = #tpu.dot_dimension_numbers<[1], [0], [0], [1], [0, 0, 1, 1], [], []>} : vector<8x32xbf16>, vector<32x512xbf16>, vector<8x512xf32> -> vector<8x512xf32>
    %c0_16 = arith.constant 0 : index
    %c512_17 = arith.constant 512 : index
    %28 = vector.load %arg3[%c0_16, %c512_17] : memref<1x2048xf32, #tpu.memory_space<vmem>>, vector<1x512xf32>
    %29 = vector.broadcast %28 : vector<1x512xf32> to vector<8x512xf32>
    %30 = arith.addf %27, %29 : vector<8x512xf32>
    %31 = arith.truncf %30 : vector<8x512xf32> to vector<8x512xbf16>
    %cst_18 = arith.constant 5.000000e-01 : bf16
    %32 = vector.broadcast %cst_18 : bf16 to vector<8x512xbf16>
    %33 = arith.mulf %32, %31 : vector<8x512xbf16>
    %cst_19 = arith.constant 7.968750e-01 : bf16
    %34 = vector.broadcast %cst_19 : bf16 to vector<8x512xbf16>
    %35 = arith.mulf %34, %31 : vector<8x512xbf16>
    %36 = arith.mulf %31, %31 : vector<8x512xbf16>
    %cst_20 = arith.constant 4.467770e-02 : bf16
    %37 = vector.broadcast %cst_20 : bf16 to vector<8x512xbf16>
    %38 = arith.mulf %37, %36 : vector<8x512xbf16>
    %cst_21 = arith.constant 1.000000e+00 : bf16
    %39 = vector.broadcast %cst_21 : bf16 to vector<8x512xbf16>
    %40 = arith.addf %39, %38 : vector<8x512xbf16>
    %41 = arith.mulf %35, %40 : vector<8x512xbf16>
    %42 = math.tanh %41 : vector<8x512xbf16>
    %cst_22 = arith.constant 1.000000e+00 : bf16
    %43 = vector.broadcast %cst_22 : bf16 to vector<8x512xbf16>
    %44 = arith.addf %43, %42 : vector<8x512xbf16>
    %45 = arith.mulf %33, %44 : vector<8x512xbf16>
    %c512_23 = arith.constant 512 : index
    %c0_24 = arith.constant 0 : index
    %46 = vector.load %arg4[%c512_23, %c0_24] : memref<2048x32xbf16, #tpu.memory_space<vmem>>, vector<512x32xbf16>
    %cst_25 = arith.constant dense<0.000000e+00> : vector<8x32xf32>
    %47 = tpu.matmul %45, %46, %cst_25 {dimension_numbers = #tpu.dot_dimension_numbers<[1], [0], [0], [1], [0, 0, 1, 1], [], []>} : vector<8x512xbf16>, vector<512x32xbf16>, vector<8x32xf32> -> vector<8x32xf32>
    %48 = arith.addf %25, %47 : vector<8x32xf32>
    %c0_26 = arith.constant 0 : index
    %c1024 = arith.constant 1024 : index
    %49 = vector.load %arg2[%c0_26, %c1024] : memref<32x2048xbf16, #tpu.memory_space<vmem>>, vector<32x512xbf16>
    %cst_27 = arith.constant dense<0.000000e+00> : vector<8x512xf32>
    %50 = tpu.matmul %1, %49, %cst_27 {dimension_numbers = #tpu.dot_dimension_numbers<[1], [0], [0], [1], [0, 0, 1, 1], [], []>} : vector<8x32xbf16>, vector<32x512xbf16>, vector<8x512xf32> -> vector<8x512xf32>
    %c0_28 = arith.constant 0 : index
    %c1024_29 = arith.constant 1024 : index
    %51 = vector.load %arg3[%c0_28, %c1024_29] : memref<1x2048xf32, #tpu.memory_space<vmem>>, vector<1x512xf32>
    %52 = vector.broadcast %51 : vector<1x512xf32> to vector<8x512xf32>
    %53 = arith.addf %50, %52 : vector<8x512xf32>
    %54 = arith.truncf %53 : vector<8x512xf32> to vector<8x512xbf16>
    %cst_30 = arith.constant 5.000000e-01 : bf16
    %55 = vector.broadcast %cst_30 : bf16 to vector<8x512xbf16>
    %56 = arith.mulf %55, %54 : vector<8x512xbf16>
    %cst_31 = arith.constant 7.968750e-01 : bf16
    %57 = vector.broadcast %cst_31 : bf16 to vector<8x512xbf16>
    %58 = arith.mulf %57, %54 : vector<8x512xbf16>
    %59 = arith.mulf %54, %54 : vector<8x512xbf16>
    %cst_32 = arith.constant 4.467770e-02 : bf16
    %60 = vector.broadcast %cst_32 : bf16 to vector<8x512xbf16>
    %61 = arith.mulf %60, %59 : vector<8x512xbf16>
    %cst_33 = arith.constant 1.000000e+00 : bf16
    %62 = vector.broadcast %cst_33 : bf16 to vector<8x512xbf16>
    %63 = arith.addf %62, %61 : vector<8x512xbf16>
    %64 = arith.mulf %58, %63 : vector<8x512xbf16>
    %65 = math.tanh %64 : vector<8x512xbf16>
    %cst_34 = arith.constant 1.000000e+00 : bf16
    %66 = vector.broadcast %cst_34 : bf16 to vector<8x512xbf16>
    %67 = arith.addf %66, %65 : vector<8x512xbf16>
    %68 = arith.mulf %56, %67 : vector<8x512xbf16>
    %c1024_35 = arith.constant 1024 : index
    %c0_36 = arith.constant 0 : index
    %69 = vector.load %arg4[%c1024_35, %c0_36] : memref<2048x32xbf16, #tpu.memory_space<vmem>>, vector<512x32xbf16>
    %cst_37 = arith.constant dense<0.000000e+00> : vector<8x32xf32>
    %70 = tpu.matmul %68, %69, %cst_37 {dimension_numbers = #tpu.dot_dimension_numbers<[1], [0], [0], [1], [0, 0, 1, 1], [], []>} : vector<8x512xbf16>, vector<512x32xbf16>, vector<8x32xf32> -> vector<8x32xf32>
    %71 = arith.addf %48, %70 : vector<8x32xf32>
    %c0_38 = arith.constant 0 : index
    %c1536 = arith.constant 1536 : index
    %72 = vector.load %arg2[%c0_38, %c1536] : memref<32x2048xbf16, #tpu.memory_space<vmem>>, vector<32x512xbf16>
    %cst_39 = arith.constant dense<0.000000e+00> : vector<8x512xf32>
    %73 = tpu.matmul %1, %72, %cst_39 {dimension_numbers = #tpu.dot_dimension_numbers<[1], [0], [0], [1], [0, 0, 1, 1], [], []>} : vector<8x32xbf16>, vector<32x512xbf16>, vector<8x512xf32> -> vector<8x512xf32>
    %c0_40 = arith.constant 0 : index
    %c1536_41 = arith.constant 1536 : index
    %74 = vector.load %arg3[%c0_40, %c1536_41] : memref<1x2048xf32, #tpu.memory_space<vmem>>, vector<1x512xf32>
    %75 = vector.broadcast %74 : vector<1x512xf32> to vector<8x512xf32>
    %76 = arith.addf %73, %75 : vector<8x512xf32>
    %77 = arith.truncf %76 : vector<8x512xf32> to vector<8x512xbf16>
    %cst_42 = arith.constant 5.000000e-01 : bf16
    %78 = vector.broadcast %cst_42 : bf16 to vector<8x512xbf16>
    %79 = arith.mulf %78, %77 : vector<8x512xbf16>
    %cst_43 = arith.constant 7.968750e-01 : bf16
    %80 = vector.broadcast %cst_43 : bf16 to vector<8x512xbf16>
    %81 = arith.mulf %80, %77 : vector<8x512xbf16>
    %82 = arith.mulf %77, %77 : vector<8x512xbf16>
    %cst_44 = arith.constant 4.467770e-02 : bf16
    %83 = vector.broadcast %cst_44 : bf16 to vector<8x512xbf16>
    %84 = arith.mulf %83, %82 : vector<8x512xbf16>
    %cst_45 = arith.constant 1.000000e+00 : bf16
    %85 = vector.broadcast %cst_45 : bf16 to vector<8x512xbf16>
    %86 = arith.addf %85, %84 : vector<8x512xbf16>
    %87 = arith.mulf %81, %86 : vector<8x512xbf16>
    %88 = math.tanh %87 : vector<8x512xbf16>
    %cst_46 = arith.constant 1.000000e+00 : bf16
    %89 = vector.broadcast %cst_46 : bf16 to vector<8x512xbf16>
    %90 = arith.addf %89, %88 : vector<8x512xbf16>
    %91 = arith.mulf %79, %90 : vector<8x512xbf16>
    %c1536_47 = arith.constant 1536 : index
    %c0_48 = arith.constant 0 : index
    %92 = vector.load %arg4[%c1536_47, %c0_48] : memref<2048x32xbf16, #tpu.memory_space<vmem>>, vector<512x32xbf16>
    %cst_49 = arith.constant dense<0.000000e+00> : vector<8x32xf32>
    %93 = tpu.matmul %91, %92, %cst_49 {dimension_numbers = #tpu.dot_dimension_numbers<[1], [0], [0], [1], [0, 0, 1, 1], [], []>} : vector<8x512xbf16>, vector<512x32xbf16>, vector<8x32xf32> -> vector<8x32xf32>
    %94 = arith.addf %71, %93 : vector<8x32xf32>
    %c0_50 = arith.constant 0 : index
    %c0_51 = arith.constant 0 : index
    %95 = vector.load %arg5[%c0_50, %c0_51] : memref<1x32xf32, #tpu.memory_space<vmem>>, vector<1x32xf32>
    %96 = vector.broadcast %95 : vector<1x32xf32> to vector<8x32xf32>
    %97 = arith.addf %94, %96 : vector<8x32xf32>
    %c0_52 = arith.constant 0 : index
    %c0_53 = arith.constant 0 : index
    %98 = vector.load %arg6[%c0_52, %c0_53] : memref<8x32xf32, #tpu.memory_space<vmem>>, vector<8x32xf32>
    tpu.vector_store %arg6[%c0_52, %c0_53], %97 {strides = array<i32>} : memref<8x32xf32, #tpu.memory_space<vmem>>, vector<8x32xf32>,
    return
  }
  func.func @transform_0(%arg0: i32) -> (i32, i32) {
    %c0_i32 = arith.constant 0 : i32
    %c0_i32_0 = arith.constant 0 : i32
    return %arg0, %c0_i32 : i32, i32
  }
  func.func @transform_1(%arg0: i32) -> (i32, i32) {
    %c0_i32 = arith.constant 0 : i32
    %c0_i32_0 = arith.constant 0 : i32
    %c0_i32_1 = arith.constant 0 : i32
    return %c0_i32, %c0_i32_0 : i32, i32
  }
  func.func @transform_2(%arg0: i32) -> (i32, i32) {
    %c0_i32 = arith.constant 0 : i32
    %c0_i32_0 = arith.constant 0 : i32
    %c0_i32_1 = arith.constant 0 : i32
    return %c0_i32, %c0_i32_0 : i32, i32
  }
  func.func @transform_3(%arg0: i32) -> (i32, i32) {
    %c0_i32 = arith.constant 0 : i32
    %c0_i32_0 = arith.constant 0 : i32
    %c0_i32_1 = arith.constant 0 : i32
    return %c0_i32, %c0_i32_0 : i32, i32
  }
  func.func @transform_4(%arg0: i32) -> (i32, i32) {
    %c0_i32 = arith.constant 0 : i32
    %c0_i32_0 = arith.constant 0 : i32
    %c0_i32_1 = arith.constant 0 : i32
    return %c0_i32, %c0_i32_0 : i32, i32
  }
  func.func @transform_5(%arg0: i32) -> (i32, i32) {
    %c0_i32 = arith.constant 0 : i32
    %c0_i32_0 = arith.constant 0 : i32
    return %arg0, %c0_i32 : i32, i32
  }
}

</mosaic_0001>

<bundles_post_ra>
// kernel: tpu_custom_call.1
= control target key start
LH: loop header
LB: loop body
LE: loop exit
PB: predicated region body
PF: predicated region fallthrough
CT: control target
= control target key end

     0   :  { %10 = vsyncpa [#allocation3], 0  ;;  %s3802_s0 = inlined_call_operand.vmem [shape: f32[16,32], index: 0, kind: input, shape index: {}]   ;;  %s3803_s1 = inlined_call_operand.vmem [shape: bf16[32,2048], index: 1, kind: input, shape index: {}]   ;;  %s3804_s2 = inlined_call_operand.vmem [shape: f32[1,2048], index: 2, kind: input, shape index: {}]   ;;  %s3805_s3 = inlined_call_operand.vmem [shape: bf16[2048,32], index: 3, kind: input, shape index: {}]   ;;  %s3806_s4 = inlined_call_operand.vmem [shape: f32[1,32], index: 4, kind: input, shape index: {}]   ;;  %s3807_s5 = inlined_call_operand.hbm [shape: f32[16,32], index: 5, kind: output, shape index: {}]  }
   0x1   :  { %12 = vsyncpa [#allocation3 + $0x1], 0  ;;  %s3078_s18 = smov 0   ;;  %s3080_s19 = smov 0  }
   0x2   :  { %s3082_s20 = smov 0   ;;  %s3084_s21 = smov 0  }
   0x3 LB: > { %s3099_s22 = sadd.s32 4294967295, %s3044_s21   ;;  %s2427_s23 = sadd.s32 4294967294, %s3044_s21   ;;  %s3044_s21 = sphi %s3084_s21, %s3813_s21   ;;  %s3040_s20 = sphi %s3082_s20, %s3812_s20   ;;  %s3036_s19 = sphi %s3080_s19, %s3811_s19   ;;  %s3032_s18 = sphi %s3078_s18, %s3810_s18  }
   0x4   : > { %s3103_s24 = sadd.s32 1, %s3044_s21   ;;  %s135_s25 = sadd.s32 1, %s3040_s20 }
   0x5   : > { %s132_s26 = ssub.s32 %s3044_s21, %s3103_s24  ;;  %p145_p0 = scmp.ne.s32.totalorder %s3040_s20, %s3036_s19 }
   0x6   : > { %p133_p1 = scmp.eq.s32.totalorder %s132_s26, 0  ;;  %p146_p2 = scmp.eq.s32.totalorder %s3099_s22, 1 }
   0x7   : > { %p151_p3 = scmp.ne.s32.totalorder %s3036_s19, %s3032_s18  ;;  %p152_p4 = scmp.eq.s32.totalorder %s2427_s23, 1 }
   0x8   : > { %s3114_s27 = scalar_select %p133_p1, %s3040_s20, %s135_s25  }
   0x9   : > { %p3116_p5 = por %p146_p2, %p145_p0  ;;  %p3120_p6 = por %p152_p4, %p151_p3 }
   0xa   : > { %p2430_p7 = scmp.ge.s32.totalorder %s3044_s21, 1  ;;  %p189_p8 = scmp.lt.s32.totalorder %s3044_s21, 3 }
   0xc   : > { %p190_p9 = pnand %p2430_p7, %p189_p8 }
   0xd   : > { %v227_v0 = vld [vmem:[%s3803_s1] sm:$0xff] (!%p190_p9)  ;;  %v228_v2 = vld [vmem:[%s3803_s1 + $0x8] sm:$0xff] (!%p190_p9)  ;;  %p216_p10 = scmp.lt.s32.totalorder (!%p190_p9), %s3099_s22, 1  ;;  %v3046_v8 = vmov (!%p190_p9), 0   ;;  %v487_v14 = vld [vmem:[%s3803_s1 + $0x10] sm:$0xff] (!%p190_p9)  ;;  %vm297_vm0 = vcmask (!%p190_p9), 261120  }
   0xe   : > { %193 = sbr.rel (%p190_p9) target bundleno = 1049 (0x419), region = 40  ;;  %v229_v1 = vld [vmem:[%s3803_s1 + $0x40] sm:$0xff] (!%p190_p9)  ;;  %v230_v4 = vld [vmem:[%s3803_s1 + $0x48] sm:$0xff] (!%p190_p9)  ;;  %333 = vmatprep.mubr.bf16.mxu0 (!%p190_p9), %v3046_v8  ;;  %374 = vmatprep.mubr.bf16.mxu1 (!%p190_p9), %v3046_v8  ;;  %v489_v16 = vld [vmem:[%s3803_s1 + $0x50] sm:$0xff] (!%p190_p9)  ;;  %s213_s23 = sand.u32 (!%p190_p9), 1, %s3036_s19  }
   0xf   : > { %v2434_v3 = vcombine.high (!%p190_p9), %v227_v0, %v229_v1  ;;  %v2433_v5 = vcombine.low (!%p190_p9), %v227_v0, %v229_v1  ;;  %v231_v6 = vld [vmem:[%s3803_s1 + $0x80] sm:$0xff] (!%p190_p9)  ;;  %v2436_v9 = vcombine.high (!%p190_p9), %v228_v2, %v230_v4  ;;  %v2435_v10 = vcombine.low (!%p190_p9), %v228_v2, %v230_v4  ;;  %v232_v12 = vld [vmem:[%s3803_s1 + $0x88] sm:$0xff] (!%p190_p9)  ;;  %v488_v17 = vld [vmem:[%s3803_s1 + $0x18] sm:$0xff] (!%p190_p9)  ;;  %s2431_s25 = sshll.u32 (!%p190_p9), %s213_s23, 3  ;;  %s2603_s7 = sshll.u32 (!%p190_p9), %s3099_s22, 7 }
  0x10   : > { %v233_v7 = vld [vmem:[%s3803_s1 + $0xc0] sm:$0xff] (!%p190_p9)  ;;  %v234_v13 = vld [vmem:[%s3803_s1 + $0xc8] sm:$0xff] (!%p190_p9)  ;;  %v490_v18 = vld [vmem:[%s3803_s1 + $0x58] sm:$0xff] (!%p190_p9)  ;;  %v2444_v23 = vcombine.high (!%p190_p9), %v487_v14, %v489_v16  ;;  %v2443_v29 = vcombine.low (!%p190_p9), %v487_v14, %v489_v16  ;;  %s215_s8 = scalar_lea.vmem (!%p190_p9), [#allocation2], %s2431_s25  ;;  %s3759_s11 = scalar_lea.hbm (!%p190_p9), %s3807_s5, %s2603_s7 }
  0x11   : > { %v2438_v11 = vcombine.high (!%p190_p9), %v231_v6, %v233_v7  ;;  %301 = vmatprep.subr.bf16.mxu0 (!%p190_p9), %v2434_v3  ;;  %v2440_v15 = vcombine.high (!%p190_p9), %v232_v12, %v234_v13  ;;  %342 = vmatprep.subr.bf16.mxu1 (!%p190_p9), %v2436_v9  ;;  %v2437_v19 = vcombine.low (!%p190_p9), %v231_v6, %v233_v7  ;;  %v491_v20 = vld [vmem:[%s3803_s1 + $0x90] sm:$0xff] (!%p190_p9)  ;;  %v492_v24 = vld [vmem:[%s3803_s1 + $0x98] sm:$0xff] (!%p190_p9)  ;;  %v2822_v35 = vld [vmem:[%s3805_s3 + $0x140] sm:$0xff] (!%p190_p9)   ;;  %s2355_s12 = scalar_lea.sflag (!%p190_p9), [#allocation3], %s213_s23 }
  0x12   : > { %302 = vmatpush1.bf16.msra.mxu0 (!%p190_p9), %v2433_v5  ;;  %v493_v21 = vld [vmem:[%s3803_s1 + $0xd0] sm:$0xff] (!%p190_p9)  ;;  %343 = vmatpush1.bf16.msra.mxu1 (!%p190_p9), %v2435_v10  ;;  %v2439_v22 = vcombine.low (!%p190_p9), %v232_v12, %v234_v13  ;;  %v494_v25 = vld [vmem:[%s3803_s1 + $0xd8] sm:$0xff] (!%p190_p9)  ;;  %v2446_v27 = vcombine.high (!%p190_p9), %v488_v17, %v490_v18  ;;  %v2445_v30 = vcombine.low (!%p190_p9), %v488_v17, %v490_v18  ;;  %v2823_v36 = vld [vmem:[%s3805_s3 + $0x1c0] sm:$0xff] (!%p190_p9)   ;;  %v237_v5 = vlaneseq (!%p190_p9) }
  0x13   : > { %303 = vmatprep.subr.bf16.mxu0 (!%p190_p9), %v2438_v11  ;;  %344 = vmatprep.subr.bf16.mxu1 (!%p190_p9), %v2440_v15  ;;  %v2448_v31 = vcombine.high (!%p190_p9), %v491_v20, %v493_v21  ;;  %v2450_v32 = vcombine.high (!%p190_p9), %v492_v24, %v494_v25  ;;  %v2447_v33 = vcombine.low (!%p190_p9), %v491_v20, %v493_v21  ;;  %v2824_v37 = vld [vmem:[%s3805_s3 + $0x100] sm:$0xff] (!%p190_p9)   ;;  %v2826_v39 = vld [vmem:[%s3805_s3 + $0x148] sm:$0xff] (!%p190_p9)   ;;  %v2830_v43 = vld [vmem:[%s3805_s3 + $0x150] sm:$0xff] (!%p190_p9)  }
  0x14   : > { %v2449_v34 = vcombine.low (!%p190_p9), %v492_v24, %v494_v25  ;;  %v2825_v38 = vld [vmem:[%s3805_s3 + $0x180] sm:$0xff] (!%p190_p9)   ;;  %v2827_v40 = vld [vmem:[%s3805_s3 + $0x1c8] sm:$0xff] (!%p190_p9)   ;;  %v2831_v44 = vld [vmem:[%s3805_s3 + $0x1d0] sm:$0xff] (!%p190_p9)   ;;  %v238_v6 = vshrl.u32 (!%p190_p9), %v237_v5, 7 }
  0x15   : > { %s217_s30 = scalar_select %p216_p10, %s3099_s22, 1  ;;  %v2828_v41 = vld [vmem:[%s3805_s3 + $0x108] sm:$0xff]   ;;  %v2832_v45 = vld [vmem:[%s3805_s3 + $0x110] sm:$0xff]   ;;  %v2834_v47 = vld [vmem:[%s3805_s3 + $0x158] sm:$0xff]  }
  0x16   : > { %304 = vmatpush1.bf16.msra.mxu0 %v2437_v19  ;;  %345 = vmatpush1.bf16.msra.mxu1 %v2439_v22  ;;  %v2829_v42 = vld [vmem:[%s3805_s3 + $0x188] sm:$0xff]   ;;  %v2833_v46 = vld [vmem:[%s3805_s3 + $0x190] sm:$0xff]   ;;  %v2835_v48 = vld [vmem:[%s3805_s3 + $0x1d8] sm:$0xff]   ;;  %v3297_v7 = vsub.s32 1, %v238_v6  ;;  %v3304_v10 = vsub.s32 3, %v238_v6  ;;  %v3317_v20 = vsub.s32 0, %v238_v6 }
  0x17   : > { %s2432_s14 = sshll.u32 %s217_s30, 3  ;;  %557 = vmatprep.subr.bf16.mxu0 %v2444_v23  ;;  %598 = vmatprep.subr.bf16.mxu1 %v2446_v27  ;;  %v2836_v49 = vld [vmem:[%s3805_s3 + $0x118] sm:$0xff]   ;;  %v2838_v51 = vld [vmem:[%s3805_s3 + $0x160] sm:$0xff]   ;;  %v2842_v55 = vld [vmem:[%s3805_s3 + $0x168] sm:$0xff]   ;;  %v3319_v24 = vsub.s32 2, %v238_v6  ;;  %s2368_s30 = sshll.u32 %s215_s8, 4  ;;  %s3761_s30 = int_to_ptr.vmem [resolvable:$true] %s2368_s30 }
  0x18   : > { %s219_s6 = scalar_lea.vmem %s3802_s0, %s2432_s14  ;;  %v2837_v50 = vld [vmem:[%s3805_s3 + $0x198] sm:$0xff]   ;;  %v2839_v52 = vld [vmem:[%s3805_s3 + $0x1e0] sm:$0xff]   ;;  %v2843_v56 = vld [vmem:[%s3805_s3 + $0x1e8] sm:$0xff]   ;;  %s2982_s13 = scalar_lea.vmem %s3761_s30, 128 }
  0x19   : > { %v225_v26 = vld [vmem:[%s219_s6] sm:$0xff]  ;;  %v2844_v57 = vld [vmem:[%s3805_s3 + $0x128] sm:$0xff]   ;;  %v2846_v59 = vld [vmem:[%s3805_s3 + $0x170] sm:$0xff]   ;;  %p2983_p11 = scmp.ne.s32.totalorder %s3761_s30, %s2982_s13  ;;  %s3047_s22 = smov [#allocation2]  }
  0x1a   : > { %v3183_v28 = vpack.c.bf16 %v225_v26, %v225_v26  ;;  %v2840_v53 = vld [vmem:[%s3805_s3 + $0x120] sm:$0xff]   ;;  %v2845_v58 = vld [vmem:[%s3805_s3 + $0x1a8] sm:$0xff]   ;;  %v2847_v60 = vld [vmem:[%s3805_s3 + $0x1f0] sm:$0xff]   ;;  %s2986_s14 = sshll.u32 %s3047_s22, 4  ;;  %s2987_s14 = int_to_ptr.vmem [resolvable:$false] %s2986_s14 }
  0x1b   : > { %v2841_v54 = vld [vmem:[%s3805_s3 + $0x1a0] sm:$0xff]   ;;  %v2848_v61 = vld [vmem:[%s3805_s3 + $0x130] sm:$0xff]   ;;  %v2850_v63 = vld [vmem:[%s3805_s3 + $0x178] sm:$0xff]   ;;  %p2984_p12 = pnand %p2983_p11, %p3116_p5  ;;  %s2988_s15 = scalar_lea.vmem %s2987_s14, 256 }
  0x1c   : > { %2441 = vmatmul.mubr.msk.bf16.vlgmr.msra.gmra.mrb[0].mxu0 %vm297_vm0, %v3183_v28  ;;  %2442 = vmatmul.mubr.msk.bf16.vlgmr.msra.gmra.mrb[0].mxu1 %vm297_vm0, %v3183_v28  ;;  %v2849_v62 = vld [vmem:[%s3805_s3 + $0x1b0] sm:$0xff]   ;;  %v2851_v0 = vld [vmem:[%s3805_s3 + $0x1f8] sm:$0xff]   ;;  %v2854_v3 = vld [vmem:[%s3805_s3 + $0x40] sm:$0xff]   ;;  %p2989_p0 = scmp.lt.s32.totalorder %s3761_s30, %s2987_s14  ;;  %p2990_p1 = scmp.lt.s32.totalorder %s2988_s15, %s2982_s13 }
  0x1d   : > { %558 = vmatpush1.bf16.msra.mxu0 %v2443_v29  ;;  %599 = vmatpush1.bf16.msra.mxu1 %v2445_v30  ;;  %v2852_v1 = vld [vmem:[%s3805_s3 + $0x138] sm:$0xff]   ;;  %v2855_v4 = vld [vmem:[%s3805_s3 + $0xc0] sm:$0xff]   ;;  %p2985_p13 = pneg %p2984_p12 }
  0x1e   : > { %559 = vmatprep.subr.bf16.mxu0 %v2448_v31  ;;  %600 = vmatprep.subr.bf16.mxu1 %v2450_v32  ;;  %v2853_v2 = vld [vmem:[%s3805_s3 + $0x1b8] sm:$0xff]   ;;  %v3302_v9 = vld [vmem:[%s3804_s2] sm:$0xf]  ;;  %v495_v19 = vld [vmem:[%s3804_s2 + $0x4] sm:$0xf]  ;;  %p2991_p2 = por %p2990_p1, %p2989_p0 }
  0x1f   : > { %589 = vmatprep.mubr.bf16.mxu0 %v3046_v8  ;;  %630 = vmatprep.mubr.bf16.mxu1 %v3046_v8  ;;  %v244_v11 = vrot.slane %v3302_v9, %v3297_v7  ;;  %v252_v12 = vrot.slane %v3302_v9, %v3304_v10  ;;  %v500_v29 = vrot.slane %v495_v19, %v3317_v20 }
  0x20   : > { %v508_v30 = vrot.slane %v495_v19, %v3319_v24  ;;  %v504_v31 = vrot.slane %v495_v19, %v3297_v7  ;;  %p2992_p3 = pnand %p2991_p2, %p2985_p13 }
  0x21   : > { %560 = vmatpush1.bf16.msra.mxu0 %v2447_v33  ;;  %601 = vmatpush1.bf16.msra.mxu1 %v2449_v34 }
  0x22   : > { %2606 = vmatprep.subr.bf16.mxu0 %v2822_v35  ;;  %2628 = vmatprep.subr.bf16.mxu1 %v2823_v36 }
  0x24   : > { %2451 = vmatmul.mubr.msk.bf16.vlgmr.msra.gmra.mrb[4].mxu0 %vm297_vm0, %v3183_v28  ;;  %2452 = vmatmul.mubr.msk.bf16.vlgmr.msra.gmra.mrb[4].mxu1 %vm297_vm0, %v3183_v28 }
  0x25   : > { %2607 = vmatpush3.bf16.msra.mxu0 %v2824_v37  ;;  %2629 = vmatpush3.bf16.msra.mxu1 %v2825_v38 }
  0x26   : > { %2608 = vmatprep.subr.bf16.mxu0 %v2826_v39  ;;  %2630 = vmatprep.subr.bf16.mxu1 %v2827_v40  ;;  %v512_v39 = vrot.slane %v495_v19, %v3304_v10 }
  0x29   : > { %2609 = vmatpush3.bf16.msra.mxu0 %v2828_v41  ;;  %2631 = vmatpush3.bf16.msra.mxu1 %v2829_v42 }
  0x2a   : > { %2610 = vmatprep.subr.bf16.mxu0 %v2830_v43  ;;  %2632 = vmatprep.subr.bf16.mxu1 %v2831_v44 }
  0x2d   : > { %2611 = vmatpush3.bf16.msra.mxu0 %v2832_v45  ;;  %2633 = vmatpush3.bf16.msra.mxu1 %v2833_v46 }
  0x2e   : > { %2612 = vmatprep.subr.bf16.mxu0 %v2834_v47  ;;  %2634 = vmatprep.subr.bf16.mxu1 %v2835_v48 }
  0x31   : > { %2613 = vmatpush3.bf16.msra.mxu0 %v2836_v49  ;;  %2635 = vmatpush3.bf16.msra.mxu1 %v2837_v50 }
  0x32   : > { %2614 = vmatprep.subr.bf16.mxu0 %v2838_v51  ;;  %2636 = vmatprep.subr.bf16.mxu1 %v2839_v52 }
  0x35   : > { %2615 = vmatpush3.bf16.msra.mxu0 %v2840_v53  ;;  %2637 = vmatpush3.bf16.msra.mxu1 %v2841_v54 }
  0x36   : > { %2616 = vmatprep.subr.bf16.mxu0 %v2842_v55  ;;  %2638 = vmatprep.subr.bf16.mxu1 %v2843_v56 }
  0x39   : > { %2617 = vmatpush3.bf16.msra.mxu0 %v2844_v57  ;;  %2639 = vmatpush3.bf16.msra.mxu1 %v2845_v58 }
  0x3a   : > { %2618 = vmatprep.subr.bf16.mxu0 %v2846_v59  ;;  %2640 = vmatprep.subr.bf16.mxu1 %v2847_v60 }
  0x3d   : > { %2619 = vmatpush3.bf16.msra.mxu0 %v2848_v61  ;;  %2641 = vmatpush3.bf16.msra.mxu1 %v2849_v62 }
  0x3e   : > { %2620 = vmatprep.subr.bf16.mxu0 %v2850_v63  ;;  %2642 = vmatprep.subr.bf16.mxu1 %v2851_v0 }
  0x41   : > { %2621 = vmatpush3.bf16.msra.mxu0 %v2852_v1  ;;  %2643 = vmatpush3.bf16.msra.mxu1 %v2853_v2 }
  0x42   : > { %2650 = vmatprep.subr.bf16.mxu0 %v2854_v3  ;;  %2672 = vmatprep.subr.bf16.mxu1 %v2855_v4 }
  0xef   : > { %v3310_v13 = vpop.f32.mrb[0].mxu0  ;;  %v3312_v14 = vpop.f32.mrb[0].mxu1 }
  0xf0   : > { %v337_v15 = vpop.f32.mrb[1].mxu0  ;;  %v378_v17 = vpop.f32.mrb[1].mxu1 }
  0xf1   : > { %v338_v16 = vadd.f32 %v337_v15, %v244_v11  ;;  %v339_v18 = vpop.f32.mrb[2].mxu0  ;;  %v379_v21 = vadd.f32 %v378_v17, %v252_v12  ;;  %v380_v22 = vpop.f32.mrb[2].mxu1 }
  0xf2   : > { %v340_v23 = vpop.f32.mrb[3].mxu0  ;;  %v381_v26 = vpop.f32.mrb[3].mxu1 }
  0xf3   : > { %v3321_v25 = vpack.c.bf16 %v338_v16, %v338_v16  ;;  %v3323_v27 = vpack.c.bf16 %v379_v21, %v379_v21  ;;  %v240_v21 = vrot.slane %v3302_v9, %v3317_v20  ;;  %v248_v23 = vrot.slane %v3302_v9, %v3319_v24 }
  0xf5   : > { %v396_v32 = vmul.bf16 %v3321_v25, %v3321_v25  ;;  %v398_v35 = vmul.bf16 %v3323_v27, %v3323_v27  ;;  %v392_v54 = vmul.bf16 1061961548, %v3321_v25  ;;  %v394_v1 = vmul.bf16 1061961548, %v3323_v27 }
  0xf6   : > { %v336_v26 = vadd.f32 %v3310_v13, %v240_v21  ;;  %v2874_v21 = vld [vmem:[%s3805_s3 + $0x68] sm:$0xff]  }
  0xf7   : > { %v591_v33 = vpop.f32.mrb[4].mxu0  ;;  %v400_v34 = vmul.bf16 1027030327, %v396_v32  ;;  %v632_v37 = vpop.f32.mrb[4].mxu1  ;;  %v402_v51 = vmul.bf16 1027030327, %v398_v35 }
  0xf8   : > { %v592_v36 = vadd.f32 %v591_v33, %v500_v29  ;;  %v593_v38 = vpop.f32.mrb[5].mxu0  ;;  %v633_v40 = vadd.f32 %v632_v37, %v508_v30  ;;  %v634_v42 = vpop.f32.mrb[5].mxu1  ;;  %v377_v30 = vadd.f32 %v3312_v14, %v248_v23  ;;  %v3351_v32 = vpack.c.bf16 %v336_v26, %v336_v26  ;;  %v2875_v23 = vld [vmem:[%s3805_s3 + $0xe8] sm:$0xff]  }
  0xf9   : > { %v594_v41 = vadd.f32 %v593_v38, %v504_v31  ;;  %v595_v43 = vpop.f32.mrb[6].mxu0  ;;  %v636_v45 = vpop.f32.mrb[6].mxu1  ;;  %v404_v50 = vadd.bf16 1065369472, %v400_v34  ;;  %v635_v52 = vadd.f32 %v634_v42, %v512_v39  ;;  %v406_v59 = vadd.bf16 1065369472, %v402_v51 }
  0xfa   : > { %v3333_v44 = vpack.c.bf16 %v592_v36, %v592_v36  ;;  %v596_v46 = vpop.f32.mrb[7].mxu0  ;;  %v3335_v47 = vpack.c.bf16 %v633_v40, %v633_v40  ;;  %v637_v49 = vpop.f32.mrb[7].mxu1  ;;  %v3353_v37 = vpack.c.bf16 %v377_v30, %v377_v30  ;;  %v395_v9 = vmul.bf16 %v3351_v32, %v3351_v32  ;;  %v2856_v45 = vld [vmem:[%s3805_s3] sm:$0xff]   ;;  %v2876_v26 = vld [vmem:[%s3805_s3 + $0x28] sm:$0xff]  }
  0xfb   : > { %v640_v48 = vpack.c.bf16 %v594_v41, %v594_v41  ;;  %v408_v58 = vmul.bf16 %v404_v50, %v392_v54  ;;  %v642_v61 = vpack.c.bf16 %v635_v52, %v635_v52  ;;  %v410_v12 = vmul.bf16 %v406_v59, %v394_v1  ;;  %v2858_v46 = vld [vmem:[%s3805_s3 + $0x48] sm:$0xff]  }
  0xfc   : > { %v651_v53 = vmul.bf16 %v3333_v44, %v3333_v44  ;;  %v653_v55 = vmul.bf16 %v3335_v47, %v3335_v47  ;;  %v647_v62 = vmul.bf16 1061961548, %v3333_v44  ;;  %v649_v2 = vmul.bf16 1061961548, %v3335_v47  ;;  %v2877_v30 = vld [vmem:[%s3805_s3 + $0xa8] sm:$0xff]  }
  0xfd   : > { %v652_v57 = vmul.bf16 %v640_v48, %v640_v48  ;;  %v654_v4 = vmul.bf16 %v642_v61, %v642_v61  ;;  %v648_v6 = vmul.bf16 1061961548, %v640_v48  ;;  %2950 = vtanh.bf16 %v408_v58  ;;  %v2859_v58 = vld [vmem:[%s3805_s3 + $0xc8] sm:$0xff]  }
  0xfe   : > { %v655_v56 = vmul.bf16 1027030327, %v651_v53  ;;  %v657_v60 = vmul.bf16 1027030327, %v653_v55  ;;  %v650_v18 = vmul.bf16 1061961548, %v642_v61 }
  0xff   : > { %v656_v0 = vmul.bf16 1027030327, %v652_v57  ;;  %v658_v16 = vmul.bf16 1027030327, %v654_v4  ;;  %v644_v38 = vmul.bf16 1056980736, %v640_v48 }
 0x100   : > { %v659_v63 = vadd.bf16 1065369472, %v655_v56  ;;  %v661_v3 = vadd.bf16 1065369472, %v657_v60  ;;  %v643_v13 = vmul.bf16 1056980736, %v3333_v44  ;;  %v397_v44 = vmul.bf16 %v3353_v37, %v3353_v37 }
 0x101   : > { %v660_v11 = vadd.bf16 1065369472, %v656_v0  ;;  %v662_v19 = vadd.bf16 1065369472, %v658_v16  ;;  %v388_v14 = vmul.bf16 1056980736, %v3321_v25 }
 0x102   : > { %v663_v5 = vmul.bf16 %v659_v63, %v647_v62  ;;  %v665_v15 = vmul.bf16 %v661_v3, %v649_v2  ;;  %v646_v48 = vmul.bf16 1056980736, %v642_v61  ;;  %v645_v52 = vmul.bf16 1056980736, %v3335_v47  ;;  %v2857_v56 = vld [vmem:[%s3805_s3 + $0x80] sm:$0xff]   ;;  %v2860_v47 = vld [vmem:[%s3805_s3 + $0x8] sm:$0xff]  }
 0x103   : > { %v664_v17 = vmul.bf16 %v660_v11, %v648_v6  ;;  %v666_v22 = vmul.bf16 %v662_v19, %v650_v18  ;;  %v399_v53 = vmul.bf16 1027030327, %v395_v9  ;;  %v390_v54 = vmul.bf16 1056980736, %v3323_v27  ;;  %v2862_v27 = vld [vmem:[%s3805_s3 + $0x50] sm:$0xff]   ;;  %v2861_v62 = vld [vmem:[%s3805_s3 + $0x88] sm:$0xff]  }
 0x104   : > { %2952 = vtanh.bf16 %v663_v5  ;;  %v401_v60 = vmul.bf16 1027030327, %v397_v44  ;;  %v2863_v63 = vld [vmem:[%s3805_s3 + $0xd0] sm:$0xff]   ;;  %v391_v1 = vmul.bf16 1061961548, %v3351_v32  ;;  %v2866_v2 = vld [vmem:[%s3805_s3 + $0x58] sm:$0xff]  }
 0x105   : > { %2954 = vtanh.bf16 %v665_v15  ;;  %v403_v61 = vadd.bf16 1065369472, %v399_v53  ;;  %v2864_v0 = vld [vmem:[%s3805_s3 + $0x10] sm:$0xff]   ;;  %v393_v6 = vmul.bf16 1061961548, %v3353_v37  ;;  %v2867_v11 = vld [vmem:[%s3805_s3 + $0xd8] sm:$0xff]  }
 0x106   : > { %2956 = vtanh.bf16 %v664_v17  ;;  %v405_v3 = vadd.bf16 1065369472, %v401_v60  ;;  %v2865_v5 = vld [vmem:[%s3805_s3 + $0x90] sm:$0xff]   ;;  %v2870_v15 = vld [vmem:[%s3805_s3 + $0x60] sm:$0xff]   ;;  %v2869_v17 = vld [vmem:[%s3805_s3 + $0x98] sm:$0xff]  }
 0x107   : > { %2958 = vtanh.bf16 %v410_v12  ;;  %v407_v4 = vmul.bf16 %v403_v61, %v391_v1  ;;  %v2868_v12 = vld [vmem:[%s3805_s3 + $0x18] sm:$0xff]   ;;  %v2871_v18 = vld [vmem:[%s3805_s3 + $0xe0] sm:$0xff]   ;;  %v1292_v53 = vld [vmem:[%s3803_s1 + $0xa8] sm:$0xff] }
 0x108   : > { %2960 = vtanh.bf16 %v666_v22  ;;  %v2951_v29 = vpop.eup %2950  ;;  %v409_v16 = vmul.bf16 %v405_v3, %v393_v6  ;;  %v2872_v19 = vld [vmem:[%s3805_s3 + $0x20] sm:$0xff]   ;;  %v2884_v9 = vld [vmem:[%s3805_s3 + $0x38] sm:$0xff]   ;;  %v2890_v61 = vld [vmem:[%s3805_s3 + $0x248] sm:$0xff]  }
 0x109   : > { %v416_v40 = vadd.bf16 1065369472, %v2951_v29  ;;  %2962 = vtanh.bf16 %v407_v4  ;;  %v2873_v22 = vld [vmem:[%s3805_s3 + $0xa0] sm:$0xff]   ;;  %v2878_v29 = vld [vmem:[%s3805_s3 + $0x70] sm:$0xff]   ;;  %v2899_v6 = vld [vmem:[%s3805_s3 + $0x2d8] sm:$0xff]  }
 0x10a   : > { %2964 = vtanh.bf16 %v409_v16  ;;  %v2889_v60 = vld [vmem:[%s3805_s3 + $0x280] sm:$0xff]   ;;  %v2894_v1 = vld [vmem:[%s3805_s3 + $0x250] sm:$0xff]  }
 0x10b   : > { %v420_v25 = vmul.bf16 %v416_v40, %v388_v14  ;;  %v2883_v40 = vld [vmem:[%s3805_s3 + $0xf8] sm:$0xff]   ;;  %v2896_v3 = vld [vmem:[%s3805_s3 + $0x210] sm:$0xff]   ;;  %v2903_v16 = vld [vmem:[%s3805_s3 + $0x2e0] sm:$0xff]  }
 0x10c   : > { %v2897_v4 = vld [vmem:[%s3805_s3 + $0x290] sm:$0xff]  }
 0x10f   : > { %v2953_v31 = vpop.eup %2952 }
 0x110   : > { %v2955_v33 = vpop.eup %2954  ;;  %v671_v35 = vadd.bf16 1065369472, %v2953_v31  ;;  %v2879_v31 = vld [vmem:[%s3805_s3 + $0xf0] sm:$0xff]  }
 0x111   : > { %v2957_v34 = vpop.eup %2956  ;;  %v673_v43 = vadd.bf16 1065369472, %v2955_v33  ;;  %v2880_v33 = vld [vmem:[%s3805_s3 + $0x30] sm:$0xff]  }
 0x112   : > { %v2959_v36 = vpop.eup %2958  ;;  %v672_v39 = vadd.bf16 1065369472, %v2957_v34  ;;  %v675_v50 = vmul.bf16 %v671_v35, %v643_v13  ;;  %v2882_v34 = vld [vmem:[%s3805_s3 + $0x78] sm:$0xff]  }
 0x113   : > { %v2961_v41 = vpop.eup %2960  ;;  %v418_v51 = vadd.bf16 1065369472, %v2959_v36  ;;  %v677_v57 = vmul.bf16 %v673_v43, %v645_v52  ;;  %v1287_v36 = vld [vmem:[%s3803_s1 + $0x20] sm:$0xff]  ;;  %v1290_v43 = vld [vmem:[%s3803_s1 + $0x68] sm:$0xff] }
 0x114   : > { %v676_v42 = vmul.bf16 %v672_v39, %v644_v38  ;;  %v674_v49 = vadd.bf16 1065369472, %v2961_v41  ;;  %v2963_v35 = vpop.eup %2962  ;;  %v1289_v38 = vld [vmem:[%s3803_s1 + $0x60] sm:$0xff]  ;;  %v2881_v39 = vld [vmem:[%s3805_s3 + $0xb0] sm:$0xff]  }
 0x115   : > { %v422_v59 = vmul.bf16 %v418_v51, %v390_v54  ;;  %v2965_v13 = vpop.eup %2964  ;;  %v415_v41 = vadd.bf16 1065369472, %v2963_v35  ;;  %v2518_v14 = vcombine.high %v1287_v36, %v1289_v38  ;;  %v2517_v51 = vcombine.low %v1287_v36, %v1289_v38  ;;  %v2916_v35 = vld [vmem:[%s3805_s3 + $0x238] sm:$0xff]   ;;  %v3586_v38 = vld [vmem:[%s3803_s1 + $0x30] sm:$0xff] }
 0x116   : > { %967 = vmatprep.mubr.bf16.mxu0 %v676_v42  ;;  %v678_v55 = vmul.bf16 %v674_v49, %v646_v48  ;;  %v1288_v42 = vld [vmem:[%s3803_s1 + $0x28] sm:$0xff]  ;;  %v387_v48 = vmul.bf16 1056980736, %v3351_v32  ;;  %v2885_v49 = vld [vmem:[%s3805_s3 + $0xb8] sm:$0xff]   ;;  %v389_v54 = vmul.bf16 1056980736, %v3353_v37 }
 0x117   : > { %968 = vmatmul.mubr.bf16.vlgmr.msra.gmra.mrb[8].mxu0 %v675_v50  ;;  %v417_v50 = vadd.bf16 1065369472, %v2965_v13  ;;  %v2520_v44 = vcombine.high %v1288_v42, %v1290_v43  ;;  %v1294_v32 = vld [vmem:[%s3803_s1 + $0xe8] sm:$0xff]  ;;  %v2886_v37 = vld [vmem:[%s3805_s3 + $0x240] sm:$0xff]   ;;  %v2917_v36 = vld [vmem:[%s3805_s3 + $0x2b8] sm:$0xff]  }
 0x118   : > { %2651 = vmatpush3.bf16.msra.mxu0 %v2856_v45  ;;  %1239 = vmatprep.mubr.bf16.mxu0 %v420_v25  ;;  %v1291_v45 = vld [vmem:[%s3803_s1 + $0xa0] sm:$0xff]  ;;  %v419_v52 = vmul.bf16 %v415_v41, %v387_v48  ;;  %v3603_v13 = vld [vmem:[%s3803_s1 + $0x78] sm:$0xff] }
 0x119   : > { %1007 = vmatprep.mubr.bf16.mxu1 %v678_v55  ;;  %2652 = vmatprep.subr.bf16.mxu0 %v2858_v46  ;;  %v1293_v46 = vld [vmem:[%s3803_s1 + $0xe0] sm:$0xff]  ;;  %v2519_v55 = vcombine.low %v1288_v42, %v1290_v43 }
 0x11a   : > { %1008 = vmatmul.mubr.bf16.vlgmr.msra.gmra.mrb[8].mxu1 %v677_v57  ;;  %v2522_v25 = vcombine.high %v1291_v45, %v1293_v46  ;;  %v2521_v57 = vcombine.low %v1291_v45, %v1293_v46 }
 0x11b   : > { %2673 = vmatpush3.bf16.msra.mxu1 %v2857_v56  ;;  %1279 = vmatprep.mubr.bf16.mxu1 %v422_v59  ;;  %v421_v56 = vmul.bf16 %v417_v50, %v389_v54  ;;  %v2887_v59 = vld [vmem:[%s3805_s3 + $0x2c0] sm:$0xff]  }
 0x11c   : > { %2674 = vmatprep.subr.bf16.mxu1 %v2859_v58  ;;  %2653 = vmatpush3.bf16.msra.mxu0 %v2860_v47  ;;  %v2524_v58 = vcombine.high %v1292_v53, %v1294_v32  ;;  %v2523_v47 = vcombine.low %v1292_v53, %v1294_v32 }
 0x11d   : > { %2654 = vmatprep.subr.bf16.mxu0 %v2862_v27  ;;  %v2888_v27 = vld [vmem:[%s3805_s3 + $0x200] sm:$0xff]  }
 0x11f   : > { %2675 = vmatpush3.bf16.msra.mxu1 %v2861_v62  ;;  %v2891_v62 = vld [vmem:[%s3805_s3 + $0x2c8] sm:$0xff]  }
 0x120   : > { %2676 = vmatprep.subr.bf16.mxu1 %v2863_v63  ;;  %2655 = vmatpush3.bf16.msra.mxu0 %v2864_v0  ;;  %v2892_v63 = vld [vmem:[%s3805_s3 + $0x208] sm:$0xff]  }
 0x121   : > { %2656 = vmatprep.subr.bf16.mxu0 %v2866_v2  ;;  %v2893_v0 = vld [vmem:[%s3805_s3 + $0x288] sm:$0xff]   ;;  %v2895_v2 = vld [vmem:[%s3805_s3 + $0x2d0] sm:$0xff]  }
 0x123   : > { %2677 = vmatpush3.bf16.msra.mxu1 %v2865_v5  ;;  %v2898_v5 = vld [vmem:[%s3805_s3 + $0x258] sm:$0xff]  }
 0x124   : > { %2678 = vmatprep.subr.bf16.mxu1 %v2867_v11  ;;  %2657 = vmatpush3.bf16.msra.mxu0 %v2868_v12  ;;  %v2900_v11 = vld [vmem:[%s3805_s3 + $0x218] sm:$0xff]  }
 0x125   : > { %2658 = vmatprep.subr.bf16.mxu0 %v2870_v15  ;;  %v2901_v12 = vld [vmem:[%s3805_s3 + $0x298] sm:$0xff]   ;;  %v2902_v15 = vld [vmem:[%s3805_s3 + $0x260] sm:$0xff]  }
 0x127   : > { %2679 = vmatpush3.bf16.msra.mxu1 %v2869_v17  ;;  %v2904_v17 = vld [vmem:[%s3805_s3 + $0x220] sm:$0xff]  }
 0x128   : > { %2680 = vmatprep.subr.bf16.mxu1 %v2871_v18  ;;  %2659 = vmatpush3.bf16.msra.mxu0 %v2872_v19  ;;  %v2905_v18 = vld [vmem:[%s3805_s3 + $0x2a0] sm:$0xff]   ;;  %v2906_v19 = vld [vmem:[%s3805_s3 + $0x268] sm:$0xff]  }
 0x129   : > { %2660 = vmatprep.subr.bf16.mxu0 %v2874_v21  ;;  %v2907_v21 = vld [vmem:[%s3805_s3 + $0x2e8] sm:$0xff]  }
 0x12b   : > { %2681 = vmatpush3.bf16.msra.mxu1 %v2873_v22  ;;  %v2908_v22 = vld [vmem:[%s3805_s3 + $0x228] sm:$0xff]  }
 0x12c   : > { %2682 = vmatprep.subr.bf16.mxu1 %v2875_v23  ;;  %2661 = vmatpush3.bf16.msra.mxu0 %v2876_v26  ;;  %v2909_v23 = vld [vmem:[%s3805_s3 + $0x2a8] sm:$0xff]   ;;  %v2910_v26 = vld [vmem:[%s3805_s3 + $0x270] sm:$0xff]  }
 0x12d   : > { %2662 = vmatprep.subr.bf16.mxu0 %v2878_v29  ;;  %v2911_v29 = vld [vmem:[%s3805_s3 + $0x2f0] sm:$0xff]  }
 0x12f   : > { %2683 = vmatpush3.bf16.msra.mxu1 %v2877_v30  ;;  %v2912_v30 = vld [vmem:[%s3805_s3 + $0x230] sm:$0xff]  }
 0x130   : > { %2684 = vmatprep.subr.bf16.mxu1 %v2879_v31  ;;  %2663 = vmatpush3.bf16.msra.mxu0 %v2880_v33  ;;  %v2913_v31 = vld [vmem:[%s3805_s3 + $0x2b0] sm:$0xff]   ;;  %v2914_v33 = vld [vmem:[%s3805_s3 + $0x278] sm:$0xff]  }
 0x131   : > { %2664 = vmatprep.subr.bf16.mxu0 %v2882_v34  ;;  %v2915_v34 = vld [vmem:[%s3805_s3 + $0x2f8] sm:$0xff]  }
 0x133   : > { %2685 = vmatpush3.bf16.msra.mxu1 %v2881_v39  ;;  %v3591_v39 = vld [vmem:[%s3803_s1 + $0x70] sm:$0xff] }
 0x134   : > { %2686 = vmatprep.subr.bf16.mxu1 %v2883_v40  ;;  %2665 = vmatpush3.bf16.msra.mxu0 %v2884_v9  ;;  %v3596_v40 = vld [vmem:[%s3803_s1 + $0x38] sm:$0xff]  ;;  %v2560_v9 = vcombine.high %v3586_v38, %v3591_v39  ;;  %v2559_v41 = vcombine.low %v3586_v38, %v3591_v39  ;;  %v2918_v38 = vld [vmem:[%s3805_s3 + $0x340] sm:$0xff]  }
 0x135   : > { %1357 = vmatprep.subr.bf16.mxu0 %v2518_v14  ;;  %v2561_v14 = vcombine.low %v3596_v40, %v3603_v13  ;;  %v2562_v42 = vcombine.high %v3596_v40, %v3603_v13  ;;  %v2919_v39 = vld [vmem:[%s3805_s3 + $0x3c0] sm:$0xff]   ;;  %v2923_v13 = vld [vmem:[%s3805_s3 + $0x3c8] sm:$0xff]  }
 0x136   : > { %v2921_v40 = vld [vmem:[%s3805_s3 + $0x380] sm:$0xff]  }
 0x137   : > { %2687 = vmatpush3.bf16.msra.mxu1 %v2885_v49  ;;  %1240 = vmatmul.mubr.bf16.vlgmr.msra.gmra.mrb[12].mxu0 %v419_v52 }
 0x138   : > { %1398 = vmatprep.subr.bf16.mxu1 %v2520_v44  ;;  %1358 = vmatpush1.bf16.msra.mxu0 %v2517_v51 }
 0x139   : > { %1359 = vmatprep.subr.bf16.mxu0 %v2522_v25  ;;  %1389 = vmatprep.mubr.bf16.mxu0 %v3046_v8 }
 0x13a   : > { %1280 = vmatmul.mubr.bf16.vlgmr.msra.gmra.mrb[12].mxu1 %v421_v56 }
 0x13b   : > { %1399 = vmatpush1.bf16.msra.mxu1 %v2519_v55  ;;  %1430 = vmatprep.mubr.bf16.mxu1 %v3046_v8 }
 0x13c   : > { %1400 = vmatprep.subr.bf16.mxu1 %v2524_v58  ;;  %1360 = vmatpush1.bf16.msra.mxu0 %v2521_v57  ;;  %v1295_v57 = vld [vmem:[%s3804_s2 + $0x8] sm:$0xf] }
 0x13d   : > { %2694 = vmatprep.subr.bf16.mxu0 %v2886_v37 }
 0x13f   : > { %1401 = vmatpush1.bf16.msra.mxu1 %v2523_v47  ;;  %2525 = vmatmul.mubr.msk.bf16.vlgmr.msra.gmra.mrb[16].mxu0 %vm297_vm0, %v3183_v28 }
 0x140   : > { %2716 = vmatprep.subr.bf16.mxu1 %v2887_v59  ;;  %2695 = vmatpush3.bf16.msra.mxu0 %v2888_v27 }
 0x141   : > { %2696 = vmatprep.subr.bf16.mxu0 %v2890_v61  ;;  %v1300_v61 = vrot.slane %v1295_v57, %v3317_v20 }
 0x142   : > { %2526 = vmatmul.mubr.msk.bf16.vlgmr.msra.gmra.mrb[16].mxu1 %vm297_vm0, %v3183_v28 }
 0x143   : > { %2717 = vmatpush3.bf16.msra.mxu1 %v2889_v60 }
 0x144   : > { %2718 = vmatprep.subr.bf16.mxu1 %v2891_v62  ;;  %2697 = vmatpush3.bf16.msra.mxu0 %v2892_v63  ;;  %v1304_v63 = vrot.slane %v1295_v57, %v3297_v7 }
 0x145   : > { %2698 = vmatprep.subr.bf16.mxu0 %v2894_v1 }
 0x147   : > { %2719 = vmatpush3.bf16.msra.mxu1 %v2893_v0 }
 0x148   : > { %2720 = vmatprep.subr.bf16.mxu1 %v2895_v2  ;;  %2699 = vmatpush3.bf16.msra.mxu0 %v2896_v3  ;;  %v1308_v2 = vrot.slane %v1295_v57, %v3319_v24 }
 0x149   : > { %2700 = vmatprep.subr.bf16.mxu0 %v2898_v5  ;;  %v1312_v5 = vrot.slane %v1295_v57, %v3304_v10 }
 0x14b   : > { %2721 = vmatpush3.bf16.msra.mxu1 %v2897_v4 }
 0x14c   : > { %2722 = vmatprep.subr.bf16.mxu1 %v2899_v6  ;;  %2701 = vmatpush3.bf16.msra.mxu0 %v2900_v11 }
 0x14d   : > { %2702 = vmatprep.subr.bf16.mxu0 %v2902_v15 }
 0x14f   : > { %2723 = vmatpush3.bf16.msra.mxu1 %v2901_v12 }
 0x150   : > { %2724 = vmatprep.subr.bf16.mxu1 %v2903_v16  ;;  %2703 = vmatpush3.bf16.msra.mxu0 %v2904_v17 }
 0x151   : > { %2704 = vmatprep.subr.bf16.mxu0 %v2906_v19 }
 0x153   : > { %2725 = vmatpush3.bf16.msra.mxu1 %v2905_v18 }
 0x154   : > { %2726 = vmatprep.subr.bf16.mxu1 %v2907_v21  ;;  %2705 = vmatpush3.bf16.msra.mxu0 %v2908_v22 }
 0x155   : > { %2706 = vmatprep.subr.bf16.mxu0 %v2910_v26 }
 0x157   : > { %2727 = vmatpush3.bf16.msra.mxu1 %v2909_v23 }
 0x158   : > { %2728 = vmatprep.subr.bf16.mxu1 %v2911_v29  ;;  %2707 = vmatpush3.bf16.msra.mxu0 %v2912_v30 }
 0x159   : > { %2708 = vmatprep.subr.bf16.mxu0 %v2914_v33 }
 0x15b   : > { %2729 = vmatpush3.bf16.msra.mxu1 %v2913_v31 }
 0x15c   : > { %2730 = vmatprep.subr.bf16.mxu1 %v2915_v34  ;;  %2709 = vmatpush3.bf16.msra.mxu0 %v2916_v35 }
 0x15d   : > { %1886 = vmatprep.subr.bf16.mxu0 %v2560_v9 }
 0x15f   : > { %2731 = vmatpush3.bf16.msra.mxu1 %v2917_v36 }
 0x160   : > { %1927 = vmatprep.subr.bf16.mxu1 %v2562_v42 }
 0x1ea   : > { %v2622_v43 = vpop.f32.mrb[8].mxu0 }
 0x1eb   : > { %v2623_v45 = vpop.f32.mrb[9].mxu0 }
 0x1ec   : > { %v2624_v46 = vadd.f32 %v2623_v45, %v2622_v43  ;;  %v2625_v48 = vpop.f32.mrb[10].mxu0 }
 0x1ed   : > { %v2644_v49 = vpop.f32.mrb[8].mxu1  ;;  %v2626_v50 = vpop.f32.mrb[11].mxu0 }
 0x1ee   : > { %v2645_v51 = vpop.f32.mrb[9].mxu1 }
 0x1ef   : > { %v2646_v44 = vadd.f32 %v2645_v51, %v2644_v49  ;;  %v2647_v52 = vpop.f32.mrb[10].mxu1 }
 0x1f0   : > { %v2648_v25 = vpop.f32.mrb[11].mxu1 }
 0x1f1   : > { %v1010_v53 = vadd.f32 %v2646_v44, %v2624_v46 }
 0x20a   : > { %v2666_v32 = vpop.f32.mrb[12].mxu0 }
 0x20b   : > { %v2667_v54 = vpop.f32.mrb[13].mxu0 }
 0x20c   : > { %v2668_v55 = vadd.f32 %v2667_v54, %v2666_v32  ;;  %v2669_v56 = vpop.f32.mrb[14].mxu0 }
 0x20d   : > { %v2688_v58 = vpop.f32.mrb[12].mxu1  ;;  %v2670_v47 = vpop.f32.mrb[15].mxu0 }
 0x20e   : > { %v1242_v37 = vadd.f32 %v2668_v55, %v1010_v53  ;;  %v2689_v59 = vpop.f32.mrb[13].mxu1  ;;  %v1820_v47 = vld [vmem:[%s3803_s1 + $0xb0] sm:$0xff] }
 0x20f   : > { %v2690_v27 = vadd.f32 %v2689_v59, %v2688_v58  ;;  %v2691_v60 = vpop.f32.mrb[14].mxu1 }
 0x210   : > { %v2692_v62 = vpop.f32.mrb[15].mxu1 }
 0x211   : > { %v3616_v0 = vadd.f32 %v2690_v27, %v1242_v37  ;;  %v1822_v37 = vld [vmem:[%s3803_s1 + $0xf0] sm:$0xff] }
 0x212   : > { %v1391_v1 = vpop.f32.mrb[16].mxu0 }
 0x213   : > { %v1392_v3 = vadd.f32 %v1391_v1, %v1300_v61  ;;  %v1393_v4 = vpop.f32.mrb[17].mxu0 }
 0x214   : > { %v1394_v6 = vadd.f32 %v1393_v4, %v1304_v63  ;;  %v1395_v11 = vpop.f32.mrb[18].mxu0  ;;  %v1821_v4 = vld [vmem:[%s3803_s1 + $0xb8] sm:$0xff] }
 0x215   : > { %v1439_v12 = vpack.c.bf16 %v1392_v3, %v1392_v3  ;;  %v1432_v15 = vpop.f32.mrb[16].mxu1  ;;  %v1396_v16 = vpop.f32.mrb[19].mxu0  ;;  %v2564_v3 = vcombine.high %v1820_v47, %v1822_v37 }
 0x216   : > { %v1433_v17 = vadd.f32 %v1432_v15, %v1308_v2  ;;  %v1440_v18 = vpack.c.bf16 %v1394_v6, %v1394_v6  ;;  %v1434_v19 = vpop.f32.mrb[17].mxu1  ;;  %v2563_v15 = vcombine.low %v1820_v47, %v1822_v37 }
 0x217   : > { %v1451_v21 = vmul.bf16 %v1439_v12, %v1439_v12  ;;  %v1435_v22 = vadd.f32 %v1434_v19, %v1312_v5  ;;  %v1436_v23 = vpop.f32.mrb[18].mxu1  ;;  %v1447_v36 = vmul.bf16 1061961548, %v1439_v12  ;;  %v1443_v27 = vmul.bf16 1056980736, %v1439_v12  ;;  %v1823_v5 = vld [vmem:[%s3803_s1 + $0xf8] sm:$0xff] }
 0x218   : > { %v1441_v26 = vpack.c.bf16 %v1433_v17, %v1433_v17  ;;  %v1452_v29 = vmul.bf16 %v1440_v18, %v1440_v18  ;;  %v1437_v30 = vpop.f32.mrb[19].mxu1  ;;  %v1448_v45 = vmul.bf16 1061961548, %v1440_v18  ;;  %v1444_v57 = vmul.bf16 1056980736, %v1440_v18  ;;  %v2926_v18 = vld [vmem:[%s3805_s3 + $0x350] sm:$0xff]  }
 0x219   : > { %v1455_v31 = vmul.bf16 1027030327, %v1451_v21  ;;  %v1442_v33 = vpack.c.bf16 %v1435_v22, %v1435_v22  ;;  %v2566_v16 = vcombine.high %v1821_v4, %v1823_v5  ;;  %v2565_v17 = vcombine.low %v1821_v4, %v1823_v5  ;;  %v2927_v19 = vld [vmem:[%s3805_s3 + $0x3d0] sm:$0xff]   ;;  %v2930_v23 = vld [vmem:[%s3805_s3 + $0x358] sm:$0xff]  }
 0x21a   : > { %v1453_v34 = vmul.bf16 %v1441_v26, %v1441_v26  ;;  %v1456_v35 = vmul.bf16 1027030327, %v1452_v29  ;;  %v1449_v50 = vmul.bf16 1061961548, %v1441_v26  ;;  %v1445_v6 = vmul.bf16 1056980736, %v1441_v26 }
 0x21b   : > { %v1459_v9 = vadd.bf16 1065369472, %v1455_v31  ;;  %v1454_v42 = vmul.bf16 %v1442_v33, %v1442_v33  ;;  %v1450_v52 = vmul.bf16 1061961548, %v1442_v33  ;;  %v1446_v63 = vmul.bf16 1056980736, %v1442_v33 }
 0x21c   : > { %v1457_v43 = vmul.bf16 1027030327, %v1453_v34  ;;  %v1460_v46 = vadd.bf16 1065369472, %v1456_v35  ;;  %v2928_v21 = vld [vmem:[%s3805_s3 + $0x310] sm:$0xff]   ;;  %v2931_v26 = vld [vmem:[%s3805_s3 + $0x3d8] sm:$0xff]  }
 0x21d   : > { %v1463_v48 = vmul.bf16 %v1459_v9, %v1447_v36  ;;  %v1458_v49 = vmul.bf16 1027030327, %v1454_v42  ;;  %v2929_v22 = vld [vmem:[%s3805_s3 + $0x390] sm:$0xff]   ;;  %v2932_v29 = vld [vmem:[%s3805_s3 + $0x318] sm:$0xff]   ;;  %v2934_v31 = vld [vmem:[%s3805_s3 + $0x360] sm:$0xff]  }
 0x21e   : > { %v1461_v51 = vadd.bf16 1065369472, %v1457_v43  ;;  %v1464_v44 = vmul.bf16 %v1460_v46, %v1448_v45  ;;  %v2933_v30 = vld [vmem:[%s3805_s3 + $0x398] sm:$0xff]   ;;  %v2935_v33 = vld [vmem:[%s3805_s3 + $0x3e0] sm:$0xff]   ;;  %v2938_v36 = vld [vmem:[%s3805_s3 + $0x368] sm:$0xff]  }
 0x21f   : > { %2966 = vtanh.bf16 %v1463_v48  ;;  %v1462_v25 = vadd.bf16 1065369472, %v1458_v49  ;;  %v2936_v34 = vld [vmem:[%s3805_s3 + $0x320] sm:$0xff]   ;;  %v2939_v9 = vld [vmem:[%s3805_s3 + $0x3e8] sm:$0xff]   ;;  %v2942_v45 = vld [vmem:[%s3805_s3 + $0x370] sm:$0xff]  }
 0x220   : > { %v1465_v53 = vmul.bf16 %v1461_v51, %v1449_v50  ;;  %2968 = vtanh.bf16 %v1464_v44  ;;  %v2937_v35 = vld [vmem:[%s3805_s3 + $0x3a0] sm:$0xff]   ;;  %v2940_v42 = vld [vmem:[%s3805_s3 + $0x328] sm:$0xff]   ;;  %v2943_v46 = vld [vmem:[%s3805_s3 + $0x3f0] sm:$0xff]  }
 0x221   : > { %v1466_v32 = vmul.bf16 %v1462_v25, %v1450_v52  ;;  %v2941_v43 = vld [vmem:[%s3805_s3 + $0x3a8] sm:$0xff]   ;;  %v2944_v48 = vld [vmem:[%s3805_s3 + $0x330] sm:$0xff]   ;;  %v2946_v50 = vld [vmem:[%s3805_s3 + $0x378] sm:$0xff]  }
 0x222   : > { %2970 = vtanh.bf16 %v1465_v53  ;;  %v2945_v49 = vld [vmem:[%s3805_s3 + $0x3b0] sm:$0xff]   ;;  %v2947_v51 = vld [vmem:[%s3805_s3 + $0x3f8] sm:$0xff]  }
 0x223   : > { %2972 = vtanh.bf16 %v1466_v32  ;;  %v2948_v44 = vld [vmem:[%s3805_s3 + $0x338] sm:$0xff]  }
 0x224   : > { %v2949_v52 = vld [vmem:[%s3805_s3 + $0x3b8] sm:$0xff]  }
 0x22a   : > { %v2967_v54 = vpop.eup %2966 }
 0x22b   : > { %v2969_v55 = vpop.eup %2968  ;;  %v1471_v56 = vadd.bf16 1065369472, %v2967_v54 }
 0x22c   : > { %v1472_v58 = vadd.bf16 1065369472, %v2969_v55  ;;  %v1824_v55 = vld [vmem:[%s3804_s2 + $0xc] sm:$0xf] }
 0x22d   : > { %v2971_v59 = vpop.eup %2970  ;;  %v1475_v2 = vmul.bf16 %v1471_v56, %v1443_v27  ;;  %v1841_v4 = vrot.slane %v1824_v55, %v3304_v10 }
 0x22e   : > { %v2973_v60 = vpop.eup %2972  ;;  %v1476_v61 = vmul.bf16 %v1472_v58, %v1444_v57  ;;  %v1473_v62 = vadd.bf16 1065369472, %v2971_v59  ;;  %v1829_v59 = vrot.slane %v1824_v55, %v3317_v20 }
 0x22f   : > { %v1474_v1 = vadd.bf16 1065369472, %v2973_v60  ;;  %v1833_v60 = vrot.slane %v1824_v55, %v3297_v7 }
 0x230   : > { %1767 = vmatprep.mubr.bf16.mxu0 %v1476_v61  ;;  %v1477_v12 = vmul.bf16 %v1473_v62, %v1445_v6 }
 0x231   : > { %v1478_v11 = vmul.bf16 %v1474_v1, %v1446_v63  ;;  %1768 = vmatmul.mubr.bf16.vlgmr.msra.gmra.mrb[20].mxu0 %v1475_v2  ;;  %v1837_v63 = vrot.slane %v1824_v55, %v3319_v24 }
 0x232   : > { %1887 = vmatpush1.bf16.msra.mxu0 %v2559_v41  ;;  %1918 = vmatprep.mubr.bf16.mxu0 %v3046_v8  ;;  %v2924_v41 = vld [vmem:[%s3805_s3 + $0x308] sm:$0xff]  }
 0x233   : > { %1807 = vmatprep.mubr.bf16.mxu1 %v1478_v11  ;;  %1888 = vmatprep.subr.bf16.mxu0 %v2564_v3 }
 0x234   : > { %1808 = vmatmul.mubr.bf16.vlgmr.msra.gmra.mrb[20].mxu1 %v1477_v12 }
 0x235   : > { %1928 = vmatpush1.bf16.msra.mxu1 %v2561_v14  ;;  %1959 = vmatprep.mubr.bf16.mxu1 %v3046_v8  ;;  %v2920_v8 = vld [vmem:[%s3805_s3 + $0x300] sm:$0xff]   ;;  %v2925_v14 = vld [vmem:[%s3805_s3 + $0x388] sm:$0xff]  }
 0x236   : > { %1929 = vmatprep.subr.bf16.mxu1 %v2566_v16  ;;  %1889 = vmatpush1.bf16.msra.mxu0 %v2563_v15 }
 0x237   : > { %2738 = vmatprep.subr.bf16.mxu0 %v2918_v38 }
 0x239   : > { %1930 = vmatpush1.bf16.msra.mxu1 %v2565_v17  ;;  %2567 = vmatmul.mubr.msk.bf16.vlgmr.msra.gmra.mrb[24].mxu0 %vm297_vm0, %v3183_v28 }
 0x23a   : > { %2760 = vmatprep.subr.bf16.mxu1 %v2919_v39  ;;  %2739 = vmatpush3.bf16.msra.mxu0 %v2920_v8 }
 0x23c   : > { %2568 = vmatmul.mubr.msk.bf16.vlgmr.msra.gmra.mrb[24].mxu1 %vm297_vm0, %v3183_v28  ;;  %v2922_v28 = vld [vmem:[%s3805_s3 + $0x348] sm:$0xff]  }
 0x23d   : > { %2761 = vmatpush3.bf16.msra.mxu1 %v2921_v40  ;;  %2740 = vmatprep.subr.bf16.mxu0 %v2922_v28 }
 0x23e   : > { %2762 = vmatprep.subr.bf16.mxu1 %v2923_v13  ;;  %2741 = vmatpush3.bf16.msra.mxu0 %v2924_v41 }
 0x23f   : > { %2742 = vmatprep.subr.bf16.mxu0 %v2926_v18 }
 0x241   : > { %2763 = vmatpush3.bf16.msra.mxu1 %v2925_v14 }
 0x242   : > { %2764 = vmatprep.subr.bf16.mxu1 %v2927_v19  ;;  %2743 = vmatpush3.bf16.msra.mxu0 %v2928_v21 }
 0x243   : > { %2744 = vmatprep.subr.bf16.mxu0 %v2930_v23 }
 0x245   : > { %2765 = vmatpush3.bf16.msra.mxu1 %v2929_v22 }
 0x246   : > { %2766 = vmatprep.subr.bf16.mxu1 %v2931_v26  ;;  %2745 = vmatpush3.bf16.msra.mxu0 %v2932_v29 }
 0x247   : > { %2746 = vmatprep.subr.bf16.mxu0 %v2934_v31 }
 0x249   : > { %2767 = vmatpush3.bf16.msra.mxu1 %v2933_v30 }
 0x24a   : > { %2768 = vmatprep.subr.bf16.mxu1 %v2935_v33  ;;  %2747 = vmatpush3.bf16.msra.mxu0 %v2936_v34 }
 0x24b   : > { %2748 = vmatprep.subr.bf16.mxu0 %v2938_v36 }
 0x24d   : > { %2769 = vmatpush3.bf16.msra.mxu1 %v2937_v35 }
 0x24e   : > { %2770 = vmatprep.subr.bf16.mxu1 %v2939_v9  ;;  %2749 = vmatpush3.bf16.msra.mxu0 %v2940_v42 }
 0x24f   : > { %2750 = vmatprep.subr.bf16.mxu0 %v2942_v45 }
 0x251   : > { %2771 = vmatpush3.bf16.msra.mxu1 %v2941_v43 }
 0x252   : > { %2772 = vmatprep.subr.bf16.mxu1 %v2943_v46  ;;  %2751 = vmatpush3.bf16.msra.mxu0 %v2944_v48 }
 0x253   : > { %2752 = vmatprep.subr.bf16.mxu0 %v2946_v50 }
 0x255   : > { %2773 = vmatpush3.bf16.msra.mxu1 %v2945_v49 }
 0x256   : > { %2774 = vmatprep.subr.bf16.mxu1 %v2947_v51  ;;  %2753 = vmatpush3.bf16.msra.mxu0 %v2948_v44 }
 0x259   : > { %2775 = vmatpush3.bf16.msra.mxu1 %v2949_v52 }
 0x304   : > { %v2710_v25 = vpop.f32.mrb[20].mxu0 }
 0x305   : > { %v2711_v53 = vpop.f32.mrb[21].mxu0 }
 0x306   : > { %v2712_v32 = vadd.f32 %v2711_v53, %v2710_v25  ;;  %v2713_v54 = vpop.f32.mrb[22].mxu0 }
 0x307   : > { %v2732_v56 = vpop.f32.mrb[20].mxu1  ;;  %v2714_v57 = vpop.f32.mrb[23].mxu0 }
 0x308   : > { %v2733_v58 = vpop.f32.mrb[21].mxu1 }
 0x309   : > { %v2734_v47 = vadd.f32 %v2733_v58, %v2732_v56  ;;  %v2735_v37 = vpop.f32.mrb[22].mxu1 }
 0x30a   : > { %v2736_v27 = vpop.f32.mrb[23].mxu1 }
 0x30b   : > { %v1810_v61 = vadd.f32 %v2734_v47, %v2712_v32 }
 0x30c   : > { %v1920_v62 = vpop.f32.mrb[24].mxu0 }
 0x30d   : > { %v3747_v1 = vadd.f32 %v1810_v61, %v3616_v0  ;;  %v1921_v2 = vadd.f32 %v1920_v62, %v1829_v59  ;;  %v1922_v3 = vpop.f32.mrb[25].mxu0 }
 0x30e   : > { %v1923_v5 = vadd.f32 %v1922_v3, %v1833_v60  ;;  %v1924_v6 = vpop.f32.mrb[26].mxu0 }
 0x30f   : > { %v1968_v11 = vpack.c.bf16 %v1921_v2, %v1921_v2  ;;  %v1961_v12 = vpop.f32.mrb[24].mxu1  ;;  %v1925_v15 = vpop.f32.mrb[27].mxu0  ;;  %v2601_v2 = vld [vmem:[%s3806_s4] ss:$0 sm:$0xff] }
 0x310   : > { %v1962_v20 = vadd.f32 %v1961_v12, %v1837_v63  ;;  %v1969_v16 = vpack.c.bf16 %v1923_v5, %v1923_v5  ;;  %v1963_v17 = vpop.f32.mrb[25].mxu1 }
 0x311   : > { %v1980_v7 = vmul.bf16 %v1968_v11, %v1968_v11  ;;  %v1964_v38 = vadd.f32 %v1963_v17, %v1841_v4  ;;  %v1965_v39 = vpop.f32.mrb[26].mxu1  ;;  %v1976_v14 = vmul.bf16 1061961548, %v1968_v11  ;;  %v1972_v49 = vmul.bf16 1056980736, %v1968_v11 }
 0x312   : > { %v1970_v8 = vpack.c.bf16 %v1962_v20, %v1962_v20  ;;  %v1981_v24 = vmul.bf16 %v1969_v16, %v1969_v16  ;;  %v1966_v40 = vpop.f32.mrb[27].mxu1  ;;  %v1977_v21 = vmul.bf16 1061961548, %v1969_v16  ;;  %v1973_v45 = vmul.bf16 1056980736, %v1969_v16 }
 0x313   : > { %v1984_v0 = vmul.bf16 1027030327, %v1980_v7  ;;  %v1971_v28 = vpack.c.bf16 %v1964_v38, %v1964_v38 }
 0x314   : > { %v1982_v13 = vmul.bf16 %v1970_v8, %v1970_v8  ;;  %v1985_v41 = vmul.bf16 1027030327, %v1981_v24  ;;  %v1978_v29 = vmul.bf16 1061961548, %v1970_v8  ;;  %v1974_v32 = vmul.bf16 1056980736, %v1970_v8 }
 0x315   : > { %v1988_v10 = vadd.bf16 1065369472, %v1984_v0  ;;  %v1983_v18 = vmul.bf16 %v1971_v28, %v1971_v28  ;;  %v1979_v33 = vmul.bf16 1061961548, %v1971_v28  ;;  %v1975_v52 = vmul.bf16 1056980736, %v1971_v28 }
 0x316   : > { %v1986_v19 = vmul.bf16 1027030327, %v1982_v13  ;;  %v1989_v22 = vadd.bf16 1065369472, %v1985_v41 }
 0x317   : > { %v1992_v23 = vmul.bf16 %v1988_v10, %v1976_v14  ;;  %v1987_v26 = vmul.bf16 1027030327, %v1983_v18 }
 0x318   : > { %v1990_v30 = vadd.bf16 1065369472, %v1986_v19  ;;  %v1993_v31 = vmul.bf16 %v1989_v22, %v1977_v21 }
 0x319   : > { %2974 = vtanh.bf16 %v1992_v23  ;;  %v1991_v34 = vadd.bf16 1065369472, %v1987_v26 }
 0x31a   : > { %v1994_v35 = vmul.bf16 %v1990_v30, %v1978_v29  ;;  %2976 = vtanh.bf16 %v1993_v31 }
 0x31b   : > { %v1995_v36 = vmul.bf16 %v1991_v34, %v1979_v33 }
 0x31c   : > { %2978 = vtanh.bf16 %v1994_v35 }
 0x31d   : > { %2980 = vtanh.bf16 %v1995_v36 }
 0x324   : > { %v2975_v9 = vpop.eup %2974 }
 0x325   : > { %v2977_v42 = vpop.eup %2976  ;;  %v2000_v43 = vadd.bf16 1065369472, %v2975_v9 }
 0x326   : > { %v2001_v46 = vadd.bf16 1065369472, %v2977_v42 }
 0x327   : > { %v2979_v48 = vpop.eup %2978  ;;  %v2004_v53 = vmul.bf16 %v2000_v43, %v1972_v49 }
 0x328   : > { %v2981_v50 = vpop.eup %2980  ;;  %v2005_v51 = vmul.bf16 %v2001_v46, %v1973_v45  ;;  %v2002_v44 = vadd.bf16 1065369472, %v2979_v48 }
 0x329   : > { %v2003_v25 = vadd.bf16 1065369472, %v2981_v50 }
 0x32a   : > { %2296 = vmatprep.mubr.bf16.mxu0 %v2005_v51  ;;  %v2006_v55 = vmul.bf16 %v2002_v44, %v1974_v32 }
 0x32b   : > { %v2007_v54 = vmul.bf16 %v2003_v25, %v1975_v52  ;;  %2297 = vmatmul.mubr.bf16.vlgmr.msra.gmra.mrb[28].mxu0 %v2004_v53 }
 0x32d   : > { %2336 = vmatprep.mubr.bf16.mxu1 %v2007_v54 }
 0x32e   : > { %2337 = vmatmul.mubr.bf16.vlgmr.msra.gmra.mrb[28].mxu1 %v2006_v55 }
 0x3fe   : > { %v2754_v56 = vpop.f32.mrb[28].mxu0 }
 0x3ff   : > { %v2755_v57 = vpop.f32.mrb[29].mxu0 }
 0x400   : > { %v2756_v58 = vadd.f32 %v2755_v57, %v2754_v56  ;;  %v2757_v47 = vpop.f32.mrb[30].mxu0 }
 0x401   : > { %v2776_v37 = vpop.f32.mrb[28].mxu1  ;;  %v2758_v59 = vpop.f32.mrb[31].mxu0 }
 0x402   : > { %v2777_v27 = vpop.f32.mrb[29].mxu1 }
 0x403   : > { %v2778_v60 = vadd.f32 %v2777_v27, %v2776_v37  ;;  %v2779_v61 = vpop.f32.mrb[30].mxu1 }
 0x404   : > { %v2780_v62 = vpop.f32.mrb[31].mxu1 }
 0x405   : > { %v2339_v63 = vadd.f32 %v2778_v60, %v2756_v58 }
 0x407   : > { %v2344_v3 = vadd.f32 %v2339_v63, %v3747_v1 }
 0x409   : > { %v2352_v4 = vadd.f32 %v2601_v2, %v2344_v3 }
 0x40b   : > { %2353 = vst.msk [vmem:[%s215_s8] sm:$0xff] %vm297_vm0, %v2352_v4 }
 0x40c   : > { %2995 = shalt.err (!%p2992_p3)
}
 0x40d   : > { %s2996_s16 = scalar_lea.hbm %s3759_s11, 128  ;;  %s3000_s25 = scalar_lea.hbm %s3807_s5, 256 }
 0x40e   : > { %p2997_p4 = scmp.ne.s32.totalorder %s3759_s11, %s2996_s16  ;;  %p3001_p9 = scmp.lt.u32.totalorder %s3759_s11, %s3807_s5 }
 0x40f   : > { %p3002_p10 = scmp.lt.u32.totalorder %s3000_s25, %s2996_s16  ;;  %p3004_p12 = scmp.lt.u32.totalorder %s2996_s16, %s3759_s11 }
 0x410   : > { %p2998_p7 = pnand %p2997_p4, %p3116_p5 }
 0x411   : > { %p3003_p11 = por %p3002_p10, %p3001_p9 }
 0x412   : > { %p2999_p8 = pneg %p2998_p7 }
 0x413   : > { %p3005_p13 = por %p3004_p12, %p3003_p11 }
 0x415   : > { %p3006_p0 = pnand %p3005_p13, %p2999_p8 }
 0x417   : > { %3009 = shalt.err (!%p3006_p0)
}
 0x418   : > { %2782 = dma.vmem_to_hbm [thread:$0]  (%p3116_p5), %s3761_s30, 128, %s3759_s11, %s2355_s12  }
 0x419 PF: > { %p2788_p1 = scmp.ge.s32.totalorder %s3044_s21, 2  ;;  %s2380_s7 = sand.u32 1, %s3032_s18  }
 0x41a   : > { %s2381_s8 = scalar_lea.sflag [#allocation3], %s2380_s7 }
 0x41b   : > { %p2785_p2 = pnand %p2788_p1, %p3120_p6 }
 0x41d   : > { %3027 = dma.done.wait (!%p2785_p2), %s2381_s8, 128  }
 0x41e   : > { %3029 = vsyncadd (!%p2785_p2), %s2381_s8, 4294967168  ;;  %p15_p3 = scmp.ge.s32.totalorder %s3103_s24, 4   ;;  %s3810_s18 = smov %s3036_s19 }
 0x41f   : > { %s3811_s19 = smov %s3040_s20  ;;  %s3812_s20 = smov %s3114_s27 }
 0x420   : > { %s3813_s21 = smov %s3103_s24  ;;  %17 = sbr.rel (!%p15_p3) target bundleno = 3 (0x3), region = 75 }
 0x427   :  { %2386 = vsyncpa [#allocation3], 1 }
 0x428   :  { %2388 = vsyncpa [#allocation3 + $0x1], 1 }

</bundles_post_ra>
